<compile_context>
chip_gen: v7x
topology: tpu7x:2x2x1
jax: 0.10.0
libtpu: 0.0.40
codegen_flags: <defaults>
</compile_context>

<pallas_src>
import functools
import math

import jax
import jax.numpy as jnp
from jax import lax
from jax.experimental import pallas as pl
from jax.experimental.pallas import tpu as pltpu

_MIB = 1024 * 1024


# ----------------------------- kernel body -------------------------------- #

def _sdpa_kernel(*refs, scale, has_mask, return_attn, lk_valid, lk_pad):
    q_ref, k_ref, v_ref = refs[0], refs[1], refs[2]
    mask_ref = refs[3] if has_mask else None
    off = 4 if has_mask else 3
    ctx_ref = refs[off]
    attn_ref = refs[off + 1] if return_attn else None

    q = q_ref[...]                      # (BT, TQ, D)   native input dtype
    k = k_ref[...]                      # (BT, Lk_pad, D)
    v = v_ref[...]                      # (BT, Lk_pad, Dv_pad)

    # scores = q @ k^T without materializing the transpose: contract the last
    # dims, batch over dim 0 (MXU, f32 accumulation, full-precision passes).
    scores = lax.dot_general(
        q, k,
        dimension_numbers=(((2,), (2,)), ((0,), (0,))),
        preferred_element_type=jnp.float32,
        precision=lax.Precision.HIGHEST,
    )                                   # (BT, TQ, Lk_pad) f32

    if scale:
        # Scale the f32 scores (same op order as the reference; VPU mults hide
        # under DMA in this HBM-bound kernel).
        scores = scores * jnp.float32(1.0 / math.sqrt(k_ref.shape[-1]))

    if mask_ref is not None:
        # masked_fill(mask, 1e-9) BEFORE softmax — faithful to the (quirky)
        # PyTorch module; masked keys keep ~uniform probability, not 0.
        scores = jnp.where(mask_ref[...] != 0, jnp.float32(1e-9), scores)

    if lk_pad > lk_valid:
        # Lane-density padding of the key axis: padded columns must not take
        # part in the softmax at all -> force them to a huge negative.
        col = lax.broadcasted_iota(jnp.int32, scores.shape, 2)
        scores = jnp.where(col < lk_valid, scores, jnp.float32(-1e30))

    # Softmax over the key axis, in f32, exact reciprocal (denominator is only
    # (BT, TQ, 1) so the exact path is essentially free).
    m = jnp.max(scores, axis=-1, keepdims=True)
    e = jnp.exp(scores - m)
    s = jnp.sum(e, axis=-1, keepdims=True)
    attn = e * pl.reciprocal(s, approx=False)

    # context = attn @ v; feed attn in v's dtype, accumulate f32 on the MXU.
    ctx = lax.dot_general(
        attn.astype(v.dtype), v,
        dimension_numbers=(((2,), (1,)), ((0,), (0,))),
        preferred_element_type=jnp.float32,
        precision=lax.Precision.HIGHEST,
    )                                   # (BT, TQ, Dv_pad) f32

    ctx_ref[...] = ctx.astype(ctx_ref.dtype)
    if attn_ref is not None:
        attn_ref[...] = attn.astype(attn_ref.dtype)


# ----------------------------- tile selection ------------------------------ #

def _vmem_budget():
    """Generation-aware (tile_budget_bytes, vmem_limit_bytes)."""
    cap = 0
    try:
        info = pltpu.get_tpu_info()
        cap = int(getattr(info, "vmem_capacity_bytes", 0) or 0)
    except Exception:
        cap = 0
    if cap >= 96 * _MIB:
        # v5e / v6e: 128 MiB VMEM per TensorCore — use it.
        return 64 * _MIB, 100 * _MIB
    if cap > 0:
        # v7x-class: 64 MiB physical per TC — leave headroom for Mosaic internals.
        return 26 * _MIB, 52 * _MIB
    # Unknown (query failed): conservative, safe on every generation.
    return 20 * _MIB, 32 * _MIB


def _estimate_tile_bytes(bt, tq, lk, d, dv, in_bytes, has_mask):
    q = bt * tq * d * in_bytes
    k = bt * lk * d * in_bytes
    v = bt * lk * dv * in_bytes
    mask = bt * tq * lk * 1 if has_mask else 0      # int8 mask
    attn = bt * tq * lk * in_bytes
    ctx = bt * tq * dv * in_bytes
    pipelined = 2 * (q + k + v + mask + attn + ctx)  # x2: double-buffering
    # f32 softmax temporaries (scores, e/attn, astype copy) + f32 ctx live in
    # the same scoped VMEM and are NOT pipelined; count them once.
    scratch = 3 * bt * tq * lk * 4 + bt * tq * dv * 4
    return pipelined + scratch


def _choose_tiles(b, lq, lk, d, dv, in_bytes, has_mask, budget):
    """Pick (batch-block BT, Lq-tile TQ) that fit the VMEM budget.

    Prefers large BT (amortizes the ~0.35us per-step overhead for tiny shapes)
    and the largest TQ that still fits (biggest-tile-that-fits rule).
    """
    tq_opts = [lq] + [c for c in (1024, 512, 256, 128, 64, 32, 16, 8)
                      if c < lq and lq % c == 0]
    bt_opts = [x for x in range(b, 0, -1) if b % x == 0]
    for bt in bt_opts:
        for tq in tq_opts:
            if _estimate_tile_bytes(bt, tq, lk, d, dv, in_bytes, has_mask) <= budget:
                return bt, tq
    # TODO(synk): stream Lk in tiles with a two-pass softmax (pass 1 for row
    # max/denominator, pass 2 to emit attn tiles and accumulate ctx) for
    # extreme sequence lengths that still overflow VMEM here — most relevant
    # on v7x's 64 MiB VMEM.
    return 1, tq_opts[-1]


def _round_up(n, m):
    return ((n + m - 1) // m) * m


def _padded_lk(lk):
    """Pad the attn last dim to a 128-multiple only if writeback overhead <= 25%.

    attn is the dominant HBM stream; for tiny Lk the padding blowup would cost
    more than masked partial stores do.
    """
    p = _round_up(lk, 128)
    return p if (p != lk and 4 * p <= 5 * lk) else lk


def _padded_dv(dv):
    """Pad the ctx last dim to a 128-multiple (lane-dense stores); ctx is a
    small stream so up to 2x padding (e.g. 64 -> 128) is worth it."""
    p = _round_up(dv, 128)
    return p if (p != dv and dv >= 64) else dv


# ------------------------------- wrapper ----------------------------------- #

def scaled_dot_product_attention(q, k, v, mask=None, scale=True, return_attn=True):
    """Pallas TPU implementation of ScaledDotProductAttention.forward.

    q: (B, Lq, D), k: (B, Lk, D), v: (B, Lk, Dv), mask: optional (B, Lq, Lk) bool.
    Returns (context (B, Lq, Dv), attn (B, Lq, Lk) or None), in q.dtype.
    """
    B, Lq, D = q.shape
    _, Lk, _ = k.shape
    Dv = v.shape[-1]
    out_dtype = q.dtype
    in_bytes = jnp.dtype(q.dtype).itemsize
    has_mask = mask is not None

    # Lane-dense padding of the output last dims (pad inputs, slice outputs).
    Lk_pad = _padded_lk(Lk)
    Dv_pad = _padded_dv(Dv)
    if Lk_pad != Lk:
        k = jnp.pad(k, ((0, 0), (0, Lk_pad - Lk), (0, 0)))
        v = jnp.pad(v, ((0, 0), (0, Lk_pad - Lk), (0, 0)))
        if has_mask:
            mask = jnp.pad(mask, ((0, 0), (0, 0), (0, Lk_pad - Lk)))
    if Dv_pad != Dv:
        v = jnp.pad(v, ((0, 0), (0, 0), (0, Dv_pad - Dv)))

    tile_budget, vmem_limit = _vmem_budget()
    BT, TQ = _choose_tiles(B, Lq, Lk_pad, D, Dv_pad, in_bytes, has_mask, tile_budget)
    n_b = B // BT
    n_q = Lq // TQ

    in_specs = [
        pl.BlockSpec((BT, TQ, D), lambda bi, qi: (bi, qi, 0)),
        # K/V block index does not depend on qi -> with qi innermost, Pallas
        # keeps the K/V tile resident across the whole Lq sweep (no re-DMA).
        pl.BlockSpec((BT, Lk_pad, D), lambda bi, qi: (bi, 0, 0)),
        pl.BlockSpec((BT, Lk_pad, Dv_pad), lambda bi, qi: (bi, 0, 0)),
    ]
    args = [q, k, v]
    if has_mask:
        in_specs.append(pl.BlockSpec((BT, TQ, Lk_pad), lambda bi, qi: (bi, qi, 0)))
        args.append(jnp.asarray(mask).astype(jnp.int8))   # 4x less mask DMA than int32

    ctx_spec = pl.BlockSpec((BT, TQ, Dv_pad), lambda bi, qi: (bi, qi, 0))
    ctx_struct = jax.ShapeDtypeStruct((B, Lq, Dv_pad), out_dtype)
    if return_attn:
        out_specs = [ctx_spec,
                     pl.BlockSpec((BT, TQ, Lk_pad), lambda bi, qi: (bi, qi, 0))]
        out_shape = (ctx_struct, jax.ShapeDtypeStruct((B, Lq, Lk_pad), out_dtype))
    else:
        # Context-only variant: skips the dominant attn writeback entirely.
        out_specs = ctx_spec
        out_shape = ctx_struct

    kernel = functools.partial(
        _sdpa_kernel, scale=scale, has_mask=has_mask, return_attn=return_attn,
        lk_valid=Lk, lk_pad=Lk_pad)

    grid_spec = pltpu.PrefetchScalarGridSpec(
        num_scalar_prefetch=0,
        # batch blocks lead, Lq tiles innermost (fastest varying) -> K/V reuse.
        grid=(n_b, n_q),
        in_specs=in_specs,
        out_specs=out_specs,
    )

    outs = pl.pallas_call(
        kernel,
        out_shape=out_shape,
        grid_spec=grid_spec,
        compiler_params=pltpu.CompilerParams(
            dimension_semantics=("parallel", "parallel"),
            vmem_limit_bytes=vmem_limit,
        ),
    )(*args)

    if return_attn:
        ctx_p, attn_p = outs
        ctx = ctx_p[:, :, :Dv] if Dv_pad != Dv else ctx_p
        attn = attn_p[:, :, :Lk] if Lk_pad != Lk else attn_p
        return ctx, attn
    ctx_p = outs
    ctx = ctx_p[:, :, :Dv] if Dv_pad != Dv else ctx_p
    return ctx, None


# ------------------------------- reference --------------------------------- #

def _reference(q, k, v, mask=None, scale=True):
    scores = jnp.einsum("bqd,bkd->bqk", q.astype(jnp.float32), k.astype(jnp.float32),
                        precision=lax.Precision.HIGHEST)
    if scale:
        scores = scores / jnp.sqrt(jnp.float32(k.shape[-1]))
    if mask is not None:
        scores = jnp.where(mask, jnp.float32(1e-9), scores)
    attn = jax.nn.softmax(scores, axis=-1)
    ctx = jnp.einsum("bqk,bkd->bqd", attn, v.astype(jnp.float32),
                     precision=lax.Precision.HIGHEST)
    return ctx, attn


if __name__ == "__main__":
    key = jax.random.PRNGKey(0)
    kq, kk, kv, km, kq2, kk2, kv2, km2 = jax.random.split(key, 8)

    # Small shapes (no padding triggered).
    B, Lq, Lk, D, Dv = 2, 8, 8, 32, 32
    q = jax.random.normal(kq, (B, Lq, D), dtype=jnp.float32)
    k = jax.random.normal(kk, (B, Lk, D), dtype=jnp.float32)
    v = jax.random.normal(kv, (B, Lk, Dv), dtype=jnp.float32)
    mask = jax.random.bernoulli(km, 0.25, (B, Lq, Lk))

    # mask=None path (mask-free kernel variant, no mask HBM traffic).
    ctx, attn = scaled_dot_product_attention(q, k, v, mask=None, scale=True)
    jax.block_until_ready((ctx, attn))
    rc, ra = _reference(q, k, v, mask=None, scale=True)
    assert jnp.allclose(ctx, rc, atol=2e-5, rtol=2e-5)
    assert jnp.allclose(attn, ra, atol=2e-5, rtol=2e-5)

    # masked path (int8 mask streamed alongside the q tiles).
    ctx_m, attn_m = scaled_dot_product_attention(q, k, v, mask=mask, scale=True)
    jax.block_until_ready((ctx_m, attn_m))
    rcm, ram = _reference(q, k, v, mask=mask, scale=True)
    assert jnp.allclose(ctx_m, rcm, atol=2e-5, rtol=2e-5)
    assert jnp.allclose(attn_m, ram, atol=2e-5, rtol=2e-5)

    # context-only variant (skips the attn writeback).
    ctx_o, attn_o = scaled_dot_product_attention(q, k, v, mask=mask, scale=True,
                                                 return_attn=False)
    jax.block_until_ready(ctx_o)
    assert attn_o is None
    assert jnp.allclose(ctx_o, rcm, atol=2e-5, rtol=2e-5)

    # Shapes that trigger lane-dense padding: Lk 600 -> 640, Dv 96 -> 128
    # (padded key columns are masked to -inf in-kernel, outputs sliced back).
    B2, Lq2, Lk2, D2, Dv2 = 1, 16, 600, 32, 96
    q2 = jax.random.normal(kq2, (B2, Lq2, D2), dtype=jnp.float32)
    k2 = jax.random.normal(kk2, (B2, Lk2, D2), dtype=jnp.float32)
    v2 = jax.random.normal(kv2, (B2, Lk2, Dv2), dtype=jnp.float32)
    mask2 = jax.random.bernoulli(km2, 0.25, (B2, Lq2, Lk2))

    ctx2, attn2 = scaled_dot_product_attention(q2, k2, v2, mask=mask2, scale=True)
    jax.block_until_ready((ctx2, attn2))
    rc2, ra2 = _reference(q2, k2, v2, mask=mask2, scale=True)
    assert ctx2.shape == (B2, Lq2, Dv2) and attn2.shape == (B2, Lq2, Lk2)
    assert jnp.allclose(ctx2, rc2, atol=2e-5, rtol=2e-5)
    assert jnp.allclose(attn2, ra2, atol=2e-5, rtol=2e-5)

    print("KERNEL_OK")
</pallas_src>

<mosaic_0001>
module attributes {stable_mosaic.version = 11 : i64} {
  func.func @_sdpa_kernel(%arg0: i32, %arg1: i32, %arg2: memref<2x8x32xf32, #tpu.memory_space<vmem>>, %arg3: memref<2x8x32xf32, #tpu.memory_space<vmem>>, %arg4: memref<2x8x32xf32, #tpu.memory_space<vmem>>, %arg5: memref<2x8x32xf32, #tpu.memory_space<vmem>>, %arg6: memref<2x8x8xf32, #tpu.memory_space<vmem>>) attributes {dimension_semantics = [#tpu.dimension_semantics<parallel>, #tpu.dimension_semantics<parallel>], iteration_bounds = array<i64: 1, 1>, scalar_prefetch = 0 : i64, scratch_operands = 0 : i64, tpu.core_type = #tpu.core_type<tc>, window_params = [{transform_indices = @transform_0, window_bounds = array<i64: 2, 8, 32>}, {transform_indices = @transform_1, window_bounds = array<i64: 2, 8, 32>}, {transform_indices = @transform_2, window_bounds = array<i64: 2, 8, 32>}, {transform_indices = @transform_3, window_bounds = array<i64: 2, 8, 32>}, {transform_indices = @transform_4, window_bounds = array<i64: 2, 8, 8>}]} {
    %c0 = arith.constant 0 : index
    %c0_0 = arith.constant 0 : index
    %c0_1 = arith.constant 0 : index
    %0 = vector.load %arg2[%c0, %c0_0, %c0_1] : memref<2x8x32xf32, #tpu.memory_space<vmem>>, vector<2x8x32xf32>
    %c0_2 = arith.constant 0 : index
    %c0_3 = arith.constant 0 : index
    %c0_4 = arith.constant 0 : index
    %1 = vector.load %arg3[%c0_2, %c0_3, %c0_4] : memref<2x8x32xf32, #tpu.memory_space<vmem>>, vector<2x8x32xf32>
    %c0_5 = arith.constant 0 : index
    %c0_6 = arith.constant 0 : index
    %c0_7 = arith.constant 0 : index
    %2 = vector.load %arg4[%c0_5, %c0_6, %c0_7] : memref<2x8x32xf32, #tpu.memory_space<vmem>>, vector<2x8x32xf32>
    %cst = arith.constant dense<0.000000e+00> : vector<2x8x8xf32>
    %3 = tpu.matmul %0, %1, %cst {dimension_numbers = #tpu.dot_dimension_numbers<[2], [2], [1], [1], [0, 0, 0, 1, 1, 1], [0], [0]>, precision = #tpu.contract_precision<fp32>} : vector<2x8x32xf32>, vector<2x8x32xf32>, vector<2x8x8xf32> -> vector<2x8x8xf32>
    %cst_8 = arith.constant 0.176776692 : f32
    %4 = vector.broadcast %cst_8 : f32 to vector<2x8x8xf32>
    %5 = arith.mulf %3, %4 : vector<2x8x8xf32>
    %cst_9 = arith.constant dense<0xFF800000> : vector<2x8xf32>
    %6 = vector.multi_reduction <maximumf>, %5, %cst_9 [2] : vector<2x8x8xf32> to vector<2x8xf32>
    %7 = vector.shape_cast %6 : vector<2x8xf32> to vector<2x8x1xf32>
    %8 = vector.broadcast %7 : vector<2x8x1xf32> to vector<2x8x8xf32>
    %9 = arith.subf %5, %8 : vector<2x8x8xf32>
    %10 = math.exp %9 : vector<2x8x8xf32>
    %cst_10 = arith.constant dense<0.000000e+00> : vector<2x8xf32>
    %11 = vector.multi_reduction <add>, %10, %cst_10 [2] : vector<2x8x8xf32> to vector<2x8xf32>
    %12 = vector.shape_cast %11 : vector<2x8xf32> to vector<2x8x1xf32>
    %13 = tpu.reciprocal %12 : vector<2x8x1xf32> -> vector<2x8x1xf32>
    %14 = vector.broadcast %13 : vector<2x8x1xf32> to vector<2x8x8xf32>
    %15 = arith.mulf %10, %14 : vector<2x8x8xf32>
    %cst_11 = arith.constant dense<0.000000e+00> : vector<2x8x32xf32>
    %16 = tpu.matmul %15, %2, %cst_11 {dimension_numbers = #tpu.dot_dimension_numbers<[2], [1], [1], [2], [0, 0, 0, 1, 1, 2], [0], [0]>, precision = #tpu.contract_precision<fp32>} : vector<2x8x8xf32>, vector<2x8x32xf32>, vector<2x8x32xf32> -> vector<2x8x32xf32>
    %c0_12 = arith.constant 0 : index
    %c0_13 = arith.constant 0 : index
    %c0_14 = arith.constant 0 : index
    %17 = vector.load %arg5[%c0_12, %c0_13, %c0_14] : memref<2x8x32xf32, #tpu.memory_space<vmem>>, vector<2x8x32xf32>
    tpu.vector_store %arg5[%c0_12, %c0_13, %c0_14], %16 {strides = array<i32>} : memref<2x8x32xf32, #tpu.memory_space<vmem>>, vector<2x8x32xf32>,
    %c0_15 = arith.constant 0 : index
    %c0_16 = arith.constant 0 : index
    %c0_17 = arith.constant 0 : index
    %18 = vector.load %arg6[%c0_15, %c0_16, %c0_17] : memref<2x8x8xf32, #tpu.memory_space<vmem>>, vector<2x8x8xf32>
    tpu.vector_store %arg6[%c0_15, %c0_16, %c0_17], %15 {strides = array<i32>} : memref<2x8x8xf32, #tpu.memory_space<vmem>>, vector<2x8x8xf32>,
    return
  }
  func.func @transform_0(%arg0: i32, %arg1: i32) -> (i32, i32, i32) {
    %c0_i32 = arith.constant 0 : i32
    %c0_i32_0 = arith.constant 0 : i32
    return %arg0, %arg1, %c0_i32 : i32, i32, i32
  }
  func.func @transform_1(%arg0: i32, %arg1: i32) -> (i32, i32, i32) {
    %c0_i32 = arith.constant 0 : i32
    %c0_i32_0 = arith.constant 0 : i32
    %c0_i32_1 = arith.constant 0 : i32
    return %arg0, %c0_i32, %c0_i32_0 : i32, i32, i32
  }
  func.func @transform_2(%arg0: i32, %arg1: i32) -> (i32, i32, i32) {
    %c0_i32 = arith.constant 0 : i32
    %c0_i32_0 = arith.constant 0 : i32
    %c0_i32_1 = arith.constant 0 : i32
    return %arg0, %c0_i32, %c0_i32_0 : i32, i32, i32
  }
  func.func @transform_3(%arg0: i32, %arg1: i32) -> (i32, i32, i32) {
    %c0_i32 = arith.constant 0 : i32
    %c0_i32_0 = arith.constant 0 : i32
    return %arg0, %arg1, %c0_i32 : i32, i32, i32
  }
  func.func @transform_4(%arg0: i32, %arg1: i32) -> (i32, i32, i32) {
    %c0_i32 = arith.constant 0 : i32
    %c0_i32_0 = arith.constant 0 : i32
    return %arg0, %arg1, %c0_i32 : i32, i32, i32
  }
}

</mosaic_0001>

<bundles_post_ra>
// kernel: tpu_custom_call.1
= control target key start
LH: loop header
LB: loop body
LE: loop exit
PB: predicated region body
PF: predicated region fallthrough
CT: control target
= control target key end

     0   :  { %10 = vsyncpa [#allocation3], 0  ;;  %s2488_s0 = inlined_call_operand.hbm [shape: f32[2,8,32], index: 0, kind: input, shape index: {}]   ;;  %s2489_s1 = inlined_call_operand.hbm [shape: f32[2,8,32], index: 1, kind: input, shape index: {}]   ;;  %s2490_s2 = inlined_call_operand.hbm [shape: f32[2,8,32], index: 2, kind: input, shape index: {}]   ;;  %s2491_s3 = inlined_call_operand.hbm [shape: f32[2,8,32], index: 3, kind: output, shape index: {0}]   ;;  %s2492_s4 = inlined_call_operand.hbm [shape: f32[2,8,8], index: 4, kind: output, shape index: {1}]  }
   0x1   :  { %11 = vsyncpa [#allocation6], 0 }
   0x2   :  { %12 = vsyncpa [#allocation4], 0 }
   0x3   :  { %13 = vsyncpa [#allocation10], 0  ;;  %s2274_s15 = smov [#allocation5]   ;;  %s2275_s17 = smov [#allocation2]  }
   0x4   :  { %s31_s16 = sshll.u32 %s2274_s15, 4  ;;  %s19_s18 = sshll.u32 %s2275_s17, 4  ;;  %s32_s16 = int_to_ptr.vmem [resolvable:$true] %s31_s16  ;;  %s2308_s18 = int_to_ptr.vmem [resolvable:$true] %s19_s18 }
   0x5   :  { %s2156_s21 = scalar_lea.hbm %s2489_s1, 256 }
   0x6   :  { %p2157_p0 = scmp.ne.s32.totalorder %s2489_s1, %s2156_s21  ;;  %p2160_p1 = scmp.lt.u32.totalorder %s2156_s21, %s2489_s1 }
   0x8   :  { %p2162_p2 = pnand %p2160_p1, %p2157_p0 }
   0xa   :  { %2165 = shalt.err (!%p2162_p2)
}
   0xb   :  { %s2166_s26 = scalar_lea.vmem %s32_s16, 256  ;;  %p2171_p4 = scmp.lt.s32.totalorder %s32_s16, %s32_s16 }
   0xc   :  { %p2167_p3 = scmp.ne.s32.totalorder %s32_s16, %s2166_s26  ;;  %p2172_p5 = scmp.lt.s32.totalorder %s2166_s26, %s2166_s26 }
   0xe   :  { %p2173_p6 = por %p2172_p5, %p2171_p4 }
  0x10   :  { %p2174_p7 = pnand %p2173_p6, %p2167_p3 }
  0x12   :  { %2177 = shalt.err (!%p2174_p7)
}
  0x13   :  { %s2276_s27 = smov 128   ;;  %s2277_s28 = smov 8  }
  0x14   :  { %37 = dma.hbm_to_vmem [thread:$0]  %s2489_s1, 256, %s32_s16, [#allocation6], %s2276_s27, %s2276_s27, %s2277_s28  }
  0x15   :  { %s2178_s7 = scalar_lea.hbm %s2488_s0, 256 }
  0x16   :  { %p2179_p8 = scmp.ne.s32.totalorder %s2488_s0, %s2178_s7  ;;  %p2182_p9 = scmp.lt.u32.totalorder %s2178_s7, %s2488_s0 }
  0x18   :  { %p2184_p10 = pnand %p2182_p9, %p2179_p8 }
  0x1a   :  { %2187 = shalt.err (!%p2184_p10)
}
  0x1b   :  { %s2188_s12 = scalar_lea.vmem %s2308_s18, 256  ;;  %p2193_p12 = scmp.lt.s32.totalorder %s2308_s18, %s2308_s18 }
  0x1c   :  { %p2189_p11 = scmp.ne.s32.totalorder %s2308_s18, %s2188_s12  ;;  %p2194_p13 = scmp.lt.s32.totalorder %s2188_s12, %s2188_s12 }
  0x1e   :  { %p2195_p0 = por %p2194_p13, %p2193_p12 }
  0x20   :  { %p2196_p1 = pnand %p2195_p0, %p2189_p11 }
  0x22   :  { %2199 = shalt.err (!%p2196_p1)
}
  0x23   :  { %25 = dma.hbm_to_vmem [thread:$0]  %s2488_s0, 256, %s2308_s18, [#allocation3], %s2276_s27, %s2276_s27, %s2277_s28  }
  0x24   :  { %s2278_s14 = smov [#allocation7]   ;;  %s2200_s19 = scalar_lea.hbm %s2490_s2, 256 }
  0x25   :  { %s43_s15 = sshll.u32 %s2278_s14, 4  ;;  %p2201_p2 = scmp.ne.s32.totalorder %s2490_s2, %s2200_s19  ;;  %s44_s15 = int_to_ptr.vmem [resolvable:$true] %s43_s15 }
  0x26   :  { %p2204_p3 = scmp.lt.u32.totalorder %s2200_s19, %s2490_s2 }
  0x28   :  { %p2206_p4 = pnand %p2204_p3, %p2201_p2 }
  0x2a   :  { %2209 = shalt.err (!%p2206_p4)
}
  0x2b   :  { %s2210_s24 = scalar_lea.vmem %s44_s15, 256  ;;  %p2215_p6 = scmp.lt.s32.totalorder %s44_s15, %s44_s15 }
  0x2c   :  { %p2211_p5 = scmp.ne.s32.totalorder %s44_s15, %s2210_s24  ;;  %p2216_p7 = scmp.lt.s32.totalorder %s2210_s24, %s2210_s24 }
  0x2e   :  { %p2217_p8 = por %p2216_p7, %p2215_p6 }
  0x30   :  { %p2218_p9 = pnand %p2217_p8, %p2211_p5 }
  0x32   :  { %2221 = shalt.err (!%p2218_p9)
}
  0x33   :  { %49 = dma.hbm_to_vmem [thread:$0]  %s2490_s2, 256, %s44_s15, [#allocation6], %s2276_s27, %s2276_s27, %s2277_s28  }
  0x34   :  { %2266 = dma.done.wait [#allocation3], 256  }
  0x35   :  { %2267 = vsyncadd [#allocation3], 4294967040 }
  0x36   :  { %2268 = dma.done.wait [#allocation6], 512  }
  0x37   :  { %2269 = vsyncadd [#allocation6], 4294966784  ;;  %v2279_v0 = vmov 0.0   ;;  %vm2280_vm0 = vmmov 0   ;;  %vm65_vm1 = vcmask 261120   ;;  %v61_v1 = vld [vmem:[#allocation5] sm:$0xff] }
  0x38   :  { %1979 = vmatprep.subr.mxu0 %v2279_v0  ;;  %2009 = vmatprep.subr.mxu1 %v2279_v0  ;;  %v62_v2 = vld [vmem:[#allocation5 + $0x8] sm:$0xff]  ;;  %v59_v3 = vld [vmem:[#allocation2] sm:$0xff]  ;;  %v70_v4 = vsel %vm65_vm1, %v61_v1, 0  ;;  %v60_v7 = vld [vmem:[#allocation2 + $0x8] sm:$0xff]  ;;  %vm972_vm2 = vcmask 64512   ;;  %s2281_s2 = smov [#allocation9]  }
  0x39   :  { %1981 = vmatprep.mubr.msk.f32.mxu0 %vm2280_vm0, %v2279_v0  ;;  %2011 = vmatprep.mubr.msk.f32.mxu1 %vm2280_vm0, %v2279_v0  ;;  %v522_v5 = vsel %vm65_vm1, %v62_v2, 0  ;;  %v67_v6 = vsel %vm65_vm1, %v59_v3, 0  ;;  %v73_v8 = vand.u32 4294901760, %v70_v4  ;;  %v519_v11 = vsel %vm65_vm1, %v60_v7, 0  ;;  %v63_v47 = vld [vmem:[#allocation7] sm:$0xff]  ;;  %v64_v49 = vld [vmem:[#allocation7 + $0x8] sm:$0xff] }
  0x3a   :  { %v525_v9 = vand.u32 4294901760, %v522_v5  ;;  %v138_v10 = vand.u32 4294901760, %v67_v6  ;;  %v590_v12 = vand.u32 4294901760, %v519_v11  ;;  %v2410_v48 = vand.u32 4294901760, %v63_v47  ;;  %s1914_s25 = sshll.u32 %s2281_s2, 4  ;;  %s1915_s25 = int_to_ptr.vmem [resolvable:$true] %s1914_s25 }
  0x3b   :  { %1980 = vmatpush3.xpose.msra.mxu0 %v73_v8  ;;  %v150_v13 = vsub.f32 %v70_v4, %v73_v8  ;;  %v2414_v50 = vand.u32 4294901760, %v64_v49  ;;  %s2222_s26 = scalar_lea.vmem %s1915_s25, 256  ;;  %p2227_p11 = scmp.lt.s32.totalorder %s1915_s25, %s1915_s25 }
  0x3c   :  { %2010 = vmatpush3.xpose.msra.mxu1 %v525_v9  ;;  %v602_v14 = vsub.f32 %v522_v5, %v525_v9  ;;  %v139_v15 = vsub.f32 %v67_v6, %v138_v10  ;;  %1984 = vmatprep.subr.mxu0 %v2279_v0  ;;  %v591_v16 = vsub.f32 %v519_v11, %v590_v12  ;;  %p2223_p10 = scmp.ne.s32.totalorder %s1915_s25, %s2222_s26  ;;  %p2228_p12 = scmp.lt.s32.totalorder %s2222_s26, %s2222_s26 }
  0x3d   :  { %2014 = vmatprep.subr.mxu1 %v2279_v0  ;;  %v151_v18 = vand.u32 4294901760, %v150_v13  ;;  %v1076_v53 = vsub.f32 %v63_v47, %v2410_v48  ;;  %v1525_v57 = vsub.f32 %v64_v49, %v2414_v50 }
  0x3e   :  { %v140_v17 = vand.u32 4294901760, %v139_v15  ;;  %v603_v19 = vand.u32 4294901760, %v602_v14  ;;  %v592_v20 = vand.u32 4294901760, %v591_v16  ;;  %p2229_p13 = por %p2228_p12, %p2227_p11 }
  0x3f   :  { %v152_v22 = vsub.f32 %v150_v13, %v151_v18  ;;  %v1077_v58 = vand.u32 4294901760, %v1076_v53  ;;  %v1526_v2 = vand.u32 4294901760, %v1525_v57 }
  0x40   :  { %v141_v21 = vsub.f32 %v139_v15, %v140_v17  ;;  %v604_v23 = vsub.f32 %v602_v14, %v603_v19  ;;  %v593_v24 = vsub.f32 %v591_v16, %v592_v20  ;;  %p2230_p0 = pnand %p2229_p13, %p2223_p10 }
  0x41   :  { %v153_v26 = vand.u32 4294901760, %v152_v22  ;;  %v1078_v1 = vsub.f32 %v1076_v53, %v1077_v58 }
  0x42   :  { %v142_v25 = vand.u32 4294901760, %v141_v21  ;;  %v605_v27 = vand.u32 4294901760, %v604_v23  ;;  %v594_v28 = vand.u32 4294901760, %v593_v24 }
  0x43   :  { %v1079_v7 = vand.u32 4294901760, %v1078_v1 }
  0x44   :  { %1982 = vmatmul.mubr.f32.vlgmr.msra.gmra.mrb[0].mxu0 %v142_v25  ;;  %2012 = vmatmul.mubr.f32.vlgmr.msra.gmra.mrb[0].mxu1 %v594_v28 }
  0x45   :  { %1985 = vmatpush3.xpose.msra.mxu0 %v153_v26  ;;  %2015 = vmatpush3.xpose.msra.mxu1 %v605_v27 }
  0x46   :  { %1986 = vmatprep.mubr.msk.f32.mxu0 %vm2280_vm0, %v2279_v0  ;;  %1989 = vmatprep.subr.mxu0 %v2279_v0 }
  0x47   :  { %2016 = vmatprep.mubr.msk.f32.mxu1 %vm2280_vm0, %v2279_v0  ;;  %2019 = vmatprep.subr.mxu1 %v2279_v0 }
  0x4c   :  { %1987 = vmatmul.mubr.f32.vlgmr.msra.gmra.mrb[0].mxu0 %v138_v10  ;;  %2017 = vmatmul.mubr.f32.vlgmr.msra.gmra.mrb[0].mxu1 %v590_v12 }
  0x4d   :  { %1990 = vmatpush3.xpose.msra.mxu0 %v150_v13  ;;  %2020 = vmatpush3.xpose.msra.mxu1 %v602_v14 }
  0x4e   :  { %1991 = vmatprep.mubr.msk.f32.mxu0 %vm2280_vm0, %v2279_v0  ;;  %1994 = vmatprep.subr.mxu0 %v2279_v0 }
  0x4f   :  { %2021 = vmatprep.mubr.msk.f32.mxu1 %vm2280_vm0, %v2279_v0  ;;  %2024 = vmatprep.subr.mxu1 %v2279_v0 }
  0x54   :  { %1992 = vmatmul.mubr.f32.vlgmr.msra.gmra.mrb[0].mxu0 %v139_v15  ;;  %2022 = vmatmul.mubr.f32.vlgmr.msra.gmra.mrb[0].mxu1 %v591_v16 }
  0x55   :  { %1995 = vmatpush3.xpose.msra.mxu0 %v73_v8  ;;  %2025 = vmatpush3.xpose.msra.mxu1 %v525_v9 }
  0x56   :  { %1996 = vmatprep.mubr.msk.f32.mxu0 %vm2280_vm0, %v2279_v0  ;;  %1999 = vmatprep.subr.mxu0 %v2279_v0 }
  0x57   :  { %2026 = vmatprep.mubr.msk.f32.mxu1 %vm2280_vm0, %v2279_v0  ;;  %2029 = vmatprep.subr.mxu1 %v2279_v0 }
  0x5c   :  { %1997 = vmatmul.mubr.f32.vlgmr.msra.gmra.mrb[0].mxu0 %v140_v17  ;;  %2027 = vmatmul.mubr.f32.vlgmr.msra.gmra.mrb[0].mxu1 %v592_v20 }
  0x5d   :  { %2000 = vmatpush3.xpose.msra.mxu0 %v151_v18  ;;  %2030 = vmatpush3.xpose.msra.mxu1 %v603_v19 }
  0x5e   :  { %2001 = vmatprep.mubr.msk.f32.mxu0 %vm2280_vm0, %v2279_v0  ;;  %2004 = vmatprep.subr.mxu0 %v2279_v0 }
  0x5f   :  { %2031 = vmatprep.mubr.msk.f32.mxu1 %vm2280_vm0, %v2279_v0  ;;  %2034 = vmatprep.subr.mxu1 %v2279_v0 }
  0x64   :  { %2002 = vmatmul.mubr.f32.vlgmr.msra.gmra.mrb[0].mxu0 %v138_v10  ;;  %2032 = vmatmul.mubr.f32.vlgmr.msra.gmra.mrb[0].mxu1 %v590_v12 }
  0x65   :  { %2005 = vmatpush3.xpose.msra.mxu0 %v73_v8  ;;  %2035 = vmatpush3.xpose.msra.mxu1 %v525_v9  ;;  %v1527_v8 = vsub.f32 %v1525_v57, %v1526_v2 }
  0x66   :  { %2006 = vmatprep.mubr.msk.f32.mxu0 %vm2280_vm0, %v2279_v0  ;;  %2036 = vmatprep.mubr.msk.f32.mxu1 %vm2280_vm0, %v2279_v0 }
  0x67   :  { %2039 = vmatprep.subr.mxu0 %v2279_v0  ;;  %2069 = vmatprep.subr.mxu1 %v2279_v0 }
  0x6c   :  { %2007 = vmatmul.mubr.f32.vlgmr.msra.gmra.mrb[0].mxu0 %v138_v10  ;;  %2037 = vmatmul.mubr.f32.vlgmr.msra.gmra.mrb[0].mxu1 %v590_v12  ;;  %v1528_v12 = vand.u32 4294901760, %v1527_v8 }
  0x6d   :  { %2041 = vmatprep.mubr.msk.f32.mxu0 %vm2280_vm0, %v2279_v0  ;;  %2071 = vmatprep.mubr.msk.f32.mxu1 %vm2280_vm0, %v2279_v0 }
  0x6e   :  { %2040 = vmatpush3.msra.mxu0 %v2410_v48  ;;  %2070 = vmatpush3.msra.mxu1 %v2414_v50 }
  0x6f   :  { %2044 = vmatprep.subr.mxu0 %v2279_v0  ;;  %2074 = vmatprep.subr.mxu1 %v2279_v0 }
 0x13f   :  { %v514_v29 = vpop.f32.mrb[0].mxu0  ;;  %v966_v31 = vpop.f32.mrb[0].mxu1 }
 0x140   :  { %v970_v30 = vmul.f32 0.17677669, %v514_v29  ;;  %v2008_v32 = vpop.f32.mrb[1].mxu0  ;;  %v2038_v33 = vpop.f32.mrb[1].mxu1  ;;  %v971_v34 = vmul.f32 0.17677669, %v966_v31 }
 0x142   :  { %v973_v35 = vsel %vm972_vm2, %v970_v30, -inf  ;;  %v976_v36 = vsel %vm972_vm2, %v971_v34, -inf }
 0x143   :  { %974 = vmax.xlane.f32.xlu0 %v973_v35 }
 0x147   :  { %977 = vmax.xlane.f32.xlu0 %v976_v36 }
 0x1d0   :  { %v975_v37 = vpop.xlane.xlu0 %974 }
 0x1d1   :  { %v979_v38 = vsub.f32 %v970_v30, %v975_v37 }
 0x1d3   :  { %v981_v39 = vmul.f32 1.442695, %v979_v38 }
 0x1d4   :  { %v978_v40 = vpop.xlane.xlu0 %977 }
 0x1d5   :  { %2148 = vpow2.f32 %v981_v39  ;;  %v980_v41 = vsub.f32 %v971_v34, %v978_v40 }
 0x1d7   :  { %v983_v42 = vmul.f32 1.442695, %v980_v41 }
 0x1d9   :  { %2150 = vpow2.f32 %v983_v42 }
 0x1df   :  { %v2149_v43 = vpop.eup %2148 }
 0x1e0   :  { %v985_v44 = vsel %vm972_vm2, %v2149_v43, 0.0 }
 0x1e1   :  { %986 = vadd.xlane.f32.xlu1 %v985_v44 }
 0x1e3   :  { %v2151_v45 = vpop.eup %2150 }
 0x1e4   :  { %v988_v46 = vsel %vm972_vm2, %v2151_v45, 0.0 }
 0x1e5   :  { %989 = vadd.xlane.f32.xlu1 %v988_v46 }
 0x26e   :  { %v987_v51 = vpop.xlane.xlu1 %986 }
 0x26f   :  { %2152 = vrcp.f32 %v987_v51 }
 0x272   :  { %v990_v52 = vpop.xlane.xlu1 %989 }
 0x273   :  { %2154 = vrcp.f32 %v990_v52 }
 0x279   :  { %v2153_v54 = vpop.eup %2152 }
 0x27a   :  { %v993_v55 = vmul.f32 %v2153_v54, %v2149_v43 }
 0x27c   :  { %1895 = vst.msk [vmem:[#allocation9] sm:$0xff] %vm972_vm2, %v993_v55  ;;  %v996_v56 = vsel %vm972_vm2, %v993_v55, 0 }
 0x27d   :  { %v2155_v59 = vpop.eup %2154  ;;  %v1064_v60 = vand.u32 4294901760, %v996_v56 }
 0x27e   :  { %v994_v61 = vmul.f32 %v2155_v59, %v2151_v45 }
 0x27f   :  { %v1065_v62 = vsub.f32 %v996_v56, %v1064_v60 }
 0x280   :  { %v1445_v63 = vsel %vm972_vm2, %v994_v61, 0  ;;  %1896 = vst.msk [vmem:[#allocation9 + $0x8] sm:$0xff] %vm972_vm2, %v994_v61 }
 0x281   :  { %v1513_v3 = vand.u32 4294901760, %v1445_v63  ;;  %v1066_v4 = vand.u32 4294901760, %v1065_v62 }
 0x283   :  { %v1067_v5 = vsub.f32 %v1065_v62, %v1066_v4  ;;  %v1514_v6 = vsub.f32 %v1445_v63, %v1513_v3 }
 0x285   :  { %v1068_v9 = vand.u32 4294901760, %v1067_v5  ;;  %v1515_v10 = vand.u32 4294901760, %v1514_v6 }
 0x287   :  { %2042 = vmatmul.mubr.f32.vlgmr.msra.gmra.mrb[2].mxu0 %v1068_v9  ;;  %v1516_v11 = vsub.f32 %v1514_v6, %v1515_v10 }
 0x288   :  { %2045 = vmatpush3.msra.mxu0 %v1079_v7  ;;  %2046 = vmatprep.mubr.msk.f32.mxu0 %vm2280_vm0, %v2279_v0 }
 0x289   :  { %v1517_v13 = vand.u32 4294901760, %v1516_v11  ;;  %2049 = vmatprep.subr.mxu0 %v2279_v0 }
 0x28b   :  { %2072 = vmatmul.mubr.f32.vlgmr.msra.gmra.mrb[2].mxu1 %v1517_v13 }
 0x28c   :  { %2075 = vmatpush3.msra.mxu1 %v1528_v12  ;;  %2076 = vmatprep.mubr.msk.f32.mxu1 %vm2280_vm0, %v2279_v0 }
 0x28d   :  { %2079 = vmatprep.subr.mxu1 %v2279_v0 }
 0x28f   :  { %2047 = vmatmul.mubr.f32.vlgmr.msra.gmra.mrb[2].mxu0 %v1064_v60 }
 0x290   :  { %2050 = vmatpush3.msra.mxu0 %v1076_v53  ;;  %2051 = vmatprep.mubr.msk.f32.mxu0 %vm2280_vm0, %v2279_v0 }
 0x291   :  { %2054 = vmatprep.subr.mxu0 %v2279_v0 }
 0x293   :  { %2077 = vmatmul.mubr.f32.vlgmr.msra.gmra.mrb[2].mxu1 %v1513_v3 }
 0x294   :  { %2080 = vmatpush3.msra.mxu1 %v1525_v57  ;;  %2081 = vmatprep.mubr.msk.f32.mxu1 %vm2280_vm0, %v2279_v0 }
 0x295   :  { %2084 = vmatprep.subr.mxu1 %v2279_v0 }
 0x297   :  { %2052 = vmatmul.mubr.f32.vlgmr.msra.gmra.mrb[2].mxu0 %v1065_v62 }
 0x298   :  { %2055 = vmatpush3.msra.mxu0 %v2410_v48  ;;  %2056 = vmatprep.mubr.msk.f32.mxu0 %vm2280_vm0, %v2279_v0 }
 0x299   :  { %2059 = vmatprep.subr.mxu0 %v2279_v0 }
 0x29b   :  { %2082 = vmatmul.mubr.f32.vlgmr.msra.gmra.mrb[2].mxu1 %v1514_v6 }
 0x29c   :  { %2085 = vmatpush3.msra.mxu1 %v2414_v50  ;;  %2086 = vmatprep.mubr.msk.f32.mxu1 %vm2280_vm0, %v2279_v0 }
 0x29d   :  { %2089 = vmatprep.subr.mxu1 %v2279_v0 }
 0x29f   :  { %2057 = vmatmul.mubr.f32.vlgmr.msra.gmra.mrb[2].mxu0 %v1066_v4 }
 0x2a0   :  { %2060 = vmatpush3.msra.mxu0 %v1077_v58  ;;  %2061 = vmatprep.mubr.msk.f32.mxu0 %vm2280_vm0, %v2279_v0 }
 0x2a1   :  { %2064 = vmatprep.subr.mxu0 %v2279_v0 }
 0x2a3   :  { %2087 = vmatmul.mubr.f32.vlgmr.msra.gmra.mrb[2].mxu1 %v1515_v10 }
 0x2a4   :  { %2090 = vmatpush3.msra.mxu1 %v1526_v2  ;;  %2091 = vmatprep.mubr.msk.f32.mxu1 %vm2280_vm0, %v2279_v0 }
 0x2a5   :  { %2094 = vmatprep.subr.mxu1 %v2279_v0 }
 0x2a7   :  { %2062 = vmatmul.mubr.f32.vlgmr.msra.gmra.mrb[2].mxu0 %v1064_v60 }
 0x2a8   :  { %2065 = vmatpush3.msra.mxu0 %v2410_v48  ;;  %2066 = vmatprep.mubr.msk.f32.mxu0 %vm2280_vm0, %v2279_v0 }
 0x2ab   :  { %2092 = vmatmul.mubr.f32.vlgmr.msra.gmra.mrb[2].mxu1 %v1513_v3 }
 0x2ac   :  { %2095 = vmatpush3.msra.mxu1 %v2414_v50  ;;  %2096 = vmatprep.mubr.msk.f32.mxu1 %vm2280_vm0, %v2279_v0 }
 0x2af   :  { %2067 = vmatmul.mubr.f32.vlgmr.msra.gmra.mrb[2].mxu0 %v1064_v60 }
 0x2b3   :  { %2097 = vmatmul.mubr.f32.vlgmr.msra.gmra.mrb[2].mxu1 %v1513_v3 }
 0x2b4   :  { %2233 = shalt.err (!%p2230_p0)
}
 0x2b5   :  { %s2234_s5 = scalar_lea.hbm %s2492_s4, 256 }
 0x2b6   :  { %p2235_p1 = scmp.ne.s32.totalorder %s2492_s4, %s2234_s5  ;;  %p2238_p2 = scmp.lt.u32.totalorder %s2234_s5, %s2492_s4 }
 0x2b8   :  { %p2240_p3 = pnand %p2238_p2, %p2235_p1 }
 0x2ba   :  { %2243 = shalt.err (!%p2240_p3)
}
 0x2bb   :  { %1920 = dma.vmem_to_hbm [thread:$0]  %s1915_s25, 256, %s2492_s4, [#allocation10], %s2276_s27, %s2276_s27, %s2277_s28  }
 0x2bc   :  { %s2282_s12 = smov [#allocation8]  }
 0x2bd   :  { %s1902_s1 = sshll.u32 %s2282_s12, 4  ;;  %s1903_s1 = int_to_ptr.vmem [resolvable:$true] %s1902_s1 }
 0x2be   :  { %s2244_s13 = scalar_lea.vmem %s1903_s1, 256  ;;  %p2249_p5 = scmp.lt.s32.totalorder %s1903_s1, %s1903_s1 }
 0x2bf   :  { %p2245_p4 = scmp.ne.s32.totalorder %s1903_s1, %s2244_s13  ;;  %p2250_p6 = scmp.lt.s32.totalorder %s2244_s13, %s2244_s13 }
 0x2c1   :  { %p2251_p7 = por %p2250_p6, %p2249_p5 }
 0x2c3   :  { %p2252_p8 = pnand %p2251_p7, %p2245_p4 }
 0x382   :  { %v1440_v0 = vpop.f32.mrb[2].mxu0 }
 0x383   :  { %1893 = vst.msk [vmem:[#allocation8] sm:$0xff] %vm65_vm1, %v1440_v0  ;;  %v2068_v14 = vpop.f32.mrb[3].mxu0 }
 0x386   :  { %v1889_v15 = vpop.f32.mrb[2].mxu1 }
 0x387   :  { %1894 = vst.msk [vmem:[#allocation8 + $0x8] sm:$0xff] %vm65_vm1, %v1889_v15  ;;  %v2098_v16 = vpop.f32.mrb[3].mxu1 }
 0x388   :  { %2255 = shalt.err (!%p2252_p8)
}
 0x389   :  { %s2256_s15 = scalar_lea.hbm %s2491_s3, 256 }
 0x38a   :  { %p2257_p9 = scmp.ne.s32.totalorder %s2491_s3, %s2256_s15  ;;  %p2260_p10 = scmp.lt.u32.totalorder %s2256_s15, %s2491_s3 }
 0x38c   :  { %p2262_p11 = pnand %p2260_p10, %p2257_p9 }
 0x38e   :  { %2265 = shalt.err (!%p2262_p11)
}
 0x38f   :  { %1908 = dma.vmem_to_hbm [thread:$0]  %s1903_s1, 256, %s2491_s3, [#allocation4], %s2276_s27, %s2276_s27, %s2277_s28  }
 0x390   :  { %2270 = dma.done.wait [#allocation4], 256  }
 0x391   :  { %2271 = vsyncadd [#allocation4], 4294967040 }
 0x392   :  { %2272 = dma.done.wait [#allocation10], 256  }
 0x393   :  { %2273 = vsyncadd [#allocation10], 4294967040 }
 0x394   :  { %1927 = vsyncpa [#allocation3], 1 }
 0x395   :  { %1928 = vsyncpa [#allocation6], 1 }
 0x396   :  { %1929 = vsyncpa [#allocation4], 1 }
 0x397   :  { %1930 = vsyncpa [#allocation10], 1 }

</bundles_post_ra>
